<compile_context>
chip_gen: v5e
topology: v5e:2x2
jax: 0.10.0
libtpu: 0.0.40
codegen_flags: <defaults>
</compile_context>

<pallas_src>
import math

import jax
import jax.numpy as jnp
from jax.experimental import pallas as pl
from jax.experimental.pallas import tpu as pltpu


def _round_up(x, m):
    return (x + m - 1) // m * m


def _clamp_vmem(needed_bytes, lo=16 << 20, hi=40 << 20):
    # margin for Mosaic internal scratch / semaphores; cap leaves headroom on
    # v7x (64 MiB physical VMEM per TensorCore).
    return int(min(max(needed_bytes + (4 << 20), lo), hi))


def _choose_tiles(n, tile_rows, tile_k):
    """Align tiles and pick a single n_pad without lcm blow-up."""
    n128 = _round_up(n, 128)
    tile_k = min(_round_up(tile_k, 128), n128)       # adj last dim: x128
    n_pad = _round_up(n, tile_k)                      # multiple of tile_k (and 128)
    tile_rows = min(_round_up(tile_rows, 8), n_pad)   # sublane aligned
    while n_pad % tile_rows:                          # must divide n_pad
        tile_rows -= 8
    # v7x has 2 TensorCores: prefer >= 2 row tiles on the "parallel" axis
    if n_pad // tile_rows < 2 and tile_rows > 8:
        tr = max(8, (tile_rows // 2) // 8 * 8)
        while n_pad % tr:
            tr -= 8
        tile_rows = tr
    return tile_rows, tile_k, n_pad


# ---------------------------------------------------------------------------
# Stage 1: node-wise feature transform   z = relu(x @ W1 + b1) @ W2 + b2
# ---------------------------------------------------------------------------
def _make_transform_kernel(n_rows, tile_rows):
    def kernel(x_ref, w1_ref, b1_ref, w2_ref, b2_ref, z_ref):
        # matmul operands arrive in compute dtype; accumulate in f32 on the MXU
        h = jnp.dot(x_ref[...], w1_ref[...], preferred_element_type=jnp.float32)
        h = jnp.maximum(h + b1_ref[...], 0.0)             # bias + ReLU in f32
        h = jnp.dot(h.astype(w2_ref.dtype), w2_ref[...],
                    preferred_element_type=jnp.float32)
        h = h + b2_ref[...]
        # zero padded node rows explicitly (robustness: downstream propagation
        # no longer relies on zero-padded adj columns for cancellation).
        row = (pl.program_id(0) * tile_rows
               + jax.lax.broadcasted_iota(jnp.int32, h.shape, 0))
        h = jnp.where(row < n_rows, h, 0.0)
        z_ref[...] = h.astype(z_ref.dtype)

    return kernel


# ---------------------------------------------------------------------------
# Stages 2/3: tiled dense propagation   out = adj @ h   (+ fused log_softmax)
# grid = (row tiles, adj-column reduction tiles); o_ref is the f32 accumulator
# (its index_map is k-invariant, so it stays resident across the reduction).
# ---------------------------------------------------------------------------
def _make_propagate_kernel(n_classes, final_logsoftmax, resident_h, tile_k,
                           cast_h_for_dot):
    def kernel(adj_ref, h_ref, o_ref):
        k = pl.program_id(1)

        @pl.when(k == 0)
        def _init():
            o_ref[...] = jnp.zeros_like(o_ref)

        if resident_h:
            start = pl.multiple_of(k * tile_k, 128)
            h = h_ref[pl.ds(start, tile_k), :]
        else:
            h = h_ref[...]
        if cast_h_for_dot:
            h = h.astype(adj_ref.dtype)                # keep the MXU in bf16
        o_ref[...] += jnp.dot(adj_ref[...], h,
                              preferred_element_type=jnp.float32)

        if final_logsoftmax:
            @pl.when(k == pl.num_programs(1) - 1)
            def _finalize():
                acc = o_ref[...]
                # mask zero-padded class lanes out of the softmax
                col = jax.lax.broadcasted_iota(jnp.int32, acc.shape, 1)
                acc = jnp.where(col < n_classes, acc, -jnp.inf)
                m = jnp.max(acc, axis=1, keepdims=True)
                s = acc - m
                lse = jnp.log(jnp.sum(jnp.exp(s), axis=1, keepdims=True))
                o_ref[...] = (s - lse).astype(o_ref.dtype)

    return kernel


# ---------------------------------------------------------------------------
# Wrappers
# ---------------------------------------------------------------------------
def prepare_adj(adj, *, tile_rows=512, tile_k=1024, compute_dtype=jnp.bfloat16):
    """Pad + cast the dense adjacency ONCE per graph (hoisted out of forward).

    Returns (adj_p, meta); pass both to sgc_forward_prepared and reuse across
    forward calls on the same graph.
    """
    n = adj.shape[0]
    tile_rows, tile_k, n_pad = _choose_tiles(n, tile_rows, tile_k)
    adj_p = jnp.pad(adj, ((0, n_pad - n), (0, n_pad - n))).astype(compute_dtype)
    return adj_p, (n, n_pad, tile_rows, tile_k)


def sgc_forward_prepared(x, adj_p, meta, w1, b1, w2, b2, *,
                         cast_h_for_dot=True,
                         resident_h_budget_bytes=28 * 1024 * 1024,
                         adj_buffers=2):
    """SGC forward (ntrans=2, nlayers=2, with_bn=False, eval mode)."""
    n, n_pad, tile_rows, tile_k = meta
    cdt = jnp.dtype(adj_p.dtype)
    f = x.shape[1]
    h_dim = w1.shape[1]
    c_dim = w2.shape[1]
    h_pad = _round_up(h_dim, 128)
    c_pad = _round_up(c_dim, 128)
    itemsize = cdt.itemsize

    x_p = jnp.pad(x, ((0, n_pad - n), (0, 0))).astype(cdt)
    w1_p = jnp.pad(w1, ((0, 0), (0, h_pad - h_dim))).astype(cdt)
    w2_p = jnp.pad(w2, ((0, h_pad - h_dim), (0, c_pad - c_dim))).astype(cdt)
    b1_p = jnp.pad(b1.reshape(-1), (0, h_pad - h_dim)).reshape(1, h_pad).astype(jnp.float32)
    b2_p = jnp.pad(b2.reshape(-1), (0, c_pad - c_dim)).reshape(1, c_pad).astype(jnp.float32)

    num_i = n_pad // tile_rows
    num_k = n_pad // tile_k

    # ----------------- stage 1: feature transform --------------------------
    # TODO(synk): for very large feature dims (f >~ 2-4K) add a K-reduction
    # over f (tile_f ~512 with an f32 acc); here x/W1 fit VMEM directly.
    s1_vmem = (2 * tile_rows * f * itemsize + 2 * f * h_pad * itemsize
               + 2 * h_pad * c_pad * itemsize + 2 * tile_rows * c_pad * 4
               + 2 * (h_pad + c_pad) * 4)
    z = pl.pallas_call(
        _make_transform_kernel(n, tile_rows),
        out_shape=jax.ShapeDtypeStruct((n_pad, c_pad), jnp.float32),
        grid_spec=pltpu.PrefetchScalarGridSpec(
            num_scalar_prefetch=0,
            grid=(num_i,),
            in_specs=[
                pl.BlockSpec((tile_rows, f), lambda i: (i, 0)),
                pl.BlockSpec((f, h_pad), lambda i: (0, 0)),      # VMEM-resident
                pl.BlockSpec((1, h_pad), lambda i: (0, 0)),
                pl.BlockSpec((h_pad, c_pad), lambda i: (0, 0)),
                pl.BlockSpec((1, c_pad), lambda i: (0, 0)),
            ],
            out_specs=pl.BlockSpec((tile_rows, c_pad), lambda i: (i, 0)),
        ),
        compiler_params=pltpu.CompilerParams(
            dimension_semantics=("parallel",),
            vmem_limit_bytes=_clamp_vmem(s1_vmem),
        ),
        cost_estimate=pl.CostEstimate(
            flops=2 * n_pad * (f * h_pad + h_pad * c_pad),
            transcendentals=0,
            bytes_accessed=int((n_pad * f + f * h_pad + h_pad * c_pad) * itemsize
                               + n_pad * c_pad * 4 + (h_pad + c_pad) * 4),
        ),
    )(x_p, w1_p, b1_p, w2_p, b2_p)

    # ----------------- stages 2/3: adjacency propagations ------------------
    h_bytes = 4  # z / p1 are stored in f32 (accuracy; negligible vs N^2 adj)
    resident_vmem = (adj_buffers * tile_rows * tile_k * itemsize
                     + 2 * n_pad * c_pad * h_bytes
                     + 2 * tile_rows * c_pad * 4)
    resident_h = resident_vmem <= resident_h_budget_bytes

    def propagate(h_in, final):
        if resident_h:
            h_spec = pl.BlockSpec((n_pad, c_pad), lambda i, k: (0, 0))
            h_hbm = n_pad * c_pad * h_bytes                 # read once, stays in VMEM
            vmem_needed = resident_vmem
        else:
            h_spec = pl.BlockSpec((tile_k, c_pad), lambda i, k: (k, 0))
            h_hbm = num_i * n_pad * c_pad * h_bytes         # re-streamed per row tile
            vmem_needed = (adj_buffers * tile_rows * tile_k * itemsize
                           + 2 * tile_k * c_pad * h_bytes
                           + 2 * tile_rows * c_pad * 4)

        adj_kwargs = {}
        if adj_buffers != 2:
            # optional deeper pipelining of the dominant adj stream (e.g. v5e)
            adj_kwargs["pipeline_mode"] = pl.Buffered(adj_buffers)
        adj_spec = pl.BlockSpec((tile_rows, tile_k), lambda i, k: (i, k),
                                **adj_kwargs)

        return pl.pallas_call(
            _make_propagate_kernel(c_dim, final, resident_h, tile_k,
                                   cast_h_for_dot),
            out_shape=jax.ShapeDtypeStruct((n_pad, c_pad), jnp.float32),
            grid_spec=pltpu.PrefetchScalarGridSpec(
                num_scalar_prefetch=0,
                grid=(num_i, num_k),                        # reduction axis last
                in_specs=[adj_spec, h_spec],
                out_specs=pl.BlockSpec((tile_rows, c_pad), lambda i, k: (i, 0)),
            ),
            compiler_params=pltpu.CompilerParams(
                dimension_semantics=("parallel", "arbitrary"),
                vmem_limit_bytes=_clamp_vmem(vmem_needed),
            ),
            cost_estimate=pl.CostEstimate(
                flops=2 * n_pad * n_pad * c_pad,
                transcendentals=n_pad * c_pad if final else 0,
                bytes_accessed=int(n_pad * n_pad * itemsize + h_hbm
                                   + n_pad * c_pad * 4),
            ),
        )(adj_p, h_in)

    p1 = propagate(z, final=False)               # first propagation (f32)
    out = propagate(p1, final=True)              # second propagation + log_softmax
    return out[:n, :c_dim]


def sgc_forward(x, adj, w1, b1, w2, b2, *, tile_rows=512, tile_k=1024,
                compute_dtype=jnp.bfloat16, **kwargs):
    """Convenience wrapper: pads/casts adj internally (prefer prepare_adj +
    sgc_forward_prepared when calling repeatedly on the same graph)."""
    adj_p, meta = prepare_adj(adj, tile_rows=tile_rows, tile_k=tile_k,
                              compute_dtype=compute_dtype)
    return sgc_forward_prepared(x, adj_p, meta, w1, b1, w2, b2, **kwargs)


# ---------------------------------------------------------------------------
# Parameter init / pure-JAX reference
# ---------------------------------------------------------------------------
def init_params(key, nfeat, nhid, nclass):
    # MyLinear.reset_parameters: uniform(-stdv, stdv), stdv = 1/sqrt(in_features)
    k1, k2, k3, k4 = jax.random.split(key, 4)
    stdv1 = 1.0 / math.sqrt(nfeat)
    stdv2 = 1.0 / math.sqrt(nhid)
    w1 = jax.random.uniform(k1, (nfeat, nhid), jnp.float32, -stdv1, stdv1)
    b1 = jax.random.uniform(k2, (nhid,), jnp.float32, -stdv1, stdv1)
    w2 = jax.random.uniform(k3, (nhid, nclass), jnp.float32, -stdv2, stdv2)
    b2 = jax.random.uniform(k4, (nclass,), jnp.float32, -stdv2, stdv2)
    return w1, b1, w2, b2


def reference_forward(x, adj, w1, b1, w2, b2):
    hp = jax.lax.Precision.HIGHEST
    h = jnp.maximum(jnp.dot(x, w1, precision=hp) + b1, 0.0)
    h = jnp.dot(h, w2, precision=hp) + b2
    h = jnp.dot(adj, jnp.dot(adj, h, precision=hp), precision=hp)
    return jax.nn.log_softmax(h, axis=1)


if __name__ == "__main__":
    # small but deliberately non-aligned shapes: exercises row/class padding,
    # a multi-tile K reduction, and both resident-h and streamed-h paths.
    N, nfeat, nhid, nclass = 200, 52, 33, 7

    key = jax.random.PRNGKey(0)
    kx, ka, kp = jax.random.split(key, 3)

    x = jax.random.normal(kx, (N, nfeat), jnp.float32)

    # symmetric, row-normalized dense adjacency (self-loops + random edges)
    a = (jax.random.uniform(ka, (N, N)) > 0.9).astype(jnp.float32)
    a = jnp.maximum(a, a.T) + jnp.eye(N, dtype=jnp.float32)
    adj = a / jnp.sum(a, axis=1, keepdims=True)

    w1, b1, w2, b2 = init_params(kp, nfeat, nhid, nclass)
    ref = reference_forward(x, adj, w1, b1, w2, b2)

    # --- exact-precision path (f32 operands): tight semantic check,
    #     small tiles => n_pad=256, tile_rows=64, tile_k=128 (num_k=2 reduction)
    adj_f32, meta_f32 = prepare_adj(adj, tile_rows=64, tile_k=128,
                                    compute_dtype=jnp.float32)
    out_f32 = sgc_forward_prepared(x, adj_f32, meta_f32, w1, b1, w2, b2)
    out_f32 = jax.block_until_ready(out_f32)
    assert out_f32.shape == (N, nclass)
    assert jnp.allclose(out_f32, ref, atol=2e-3, rtol=2e-3), \
        f"f32 path max err {float(jnp.max(jnp.abs(out_f32 - ref))):.3e}"

    # --- optimized bf16 path: adj prepared once per graph, reused across calls
    adj_bf, meta_bf = prepare_adj(adj)  # default tiles, clamped to the graph
    out_bf = jax.block_until_ready(
        sgc_forward_prepared(x, adj_bf, meta_bf, w1, b1, w2, b2))
    assert out_bf.shape == (N, nclass)
    assert jnp.allclose(out_bf, ref, atol=5e-2, rtol=5e-2), \
        f"bf16 path max err {float(jnp.max(jnp.abs(out_bf - ref))):.3e}"

    # second forward on the same prepared adjacency (hoisted pad/cast reuse)
    out_bf2 = jax.block_until_ready(
        sgc_forward_prepared(x, adj_bf, meta_bf, w1, b1, w2, b2))
    assert jnp.allclose(out_bf2, out_bf)

    # --- force the streamed-h fallback (large-graph code path) and verify
    out_stream = jax.block_until_ready(
        sgc_forward_prepared(x, adj_bf, meta_bf, w1, b1, w2, b2,
                             resident_h_budget_bytes=0))
    assert jnp.allclose(out_stream, ref, atol=5e-2, rtol=5e-2), \
        f"streamed-h path max err {float(jnp.max(jnp.abs(out_stream - ref))):.3e}"

    print("KERNEL_OK")
</pallas_src>

<mosaic_0001>
module attributes {stable_mosaic.version = 11 : i64} {
  func.func @kernel(%arg0: i32, %arg1: memref<64x52xf32, #tpu.memory_space<vmem>>, %arg2: memref<52x128xf32, #tpu.memory_space<vmem>>, %arg3: memref<1x128xf32, #tpu.memory_space<vmem>>, %arg4: memref<128x128xf32, #tpu.memory_space<vmem>>, %arg5: memref<1x128xf32, #tpu.memory_space<vmem>>, %arg6: memref<64x128xf32, #tpu.memory_space<vmem>>) attributes {dimension_semantics = [#tpu.dimension_semantics<parallel>], iteration_bounds = array<i64: 4>, scalar_prefetch = 0 : i64, scratch_operands = 0 : i64, tpu.core_type = #tpu.core_type<tc>, window_params = [{transform_indices = @transform_0, window_bounds = array<i64: 64, 52>}, {pipeline_mode = #tpu.pipeline_mode<synchronous>, transform_indices = @transform_1, window_bounds = array<i64: 52, 128>}, {pipeline_mode = #tpu.pipeline_mode<synchronous>, transform_indices = @transform_2, window_bounds = array<i64: 1, 128>}, {pipeline_mode = #tpu.pipeline_mode<synchronous>, transform_indices = @transform_3, window_bounds = array<i64: 128, 128>}, {pipeline_mode = #tpu.pipeline_mode<synchronous>, transform_indices = @transform_4, window_bounds = array<i64: 1, 128>}, {transform_indices = @transform_5, window_bounds = array<i64: 64, 128>}]} {
    %c0 = arith.constant 0 : index
    %c0_0 = arith.constant 0 : index
    %0 = vector.load %arg1[%c0, %c0_0] : memref<64x52xf32, #tpu.memory_space<vmem>>, vector<64x52xf32>
    %c0_1 = arith.constant 0 : index
    %c0_2 = arith.constant 0 : index
    %1 = vector.load %arg2[%c0_1, %c0_2] : memref<52x128xf32, #tpu.memory_space<vmem>>, vector<52x128xf32>
    %cst = arith.constant dense<0.000000e+00> : vector<64x128xf32>
    %2 = tpu.matmul %0, %1, %cst {dimension_numbers = #tpu.dot_dimension_numbers<[1], [0], [0], [1], [0, 0, 1, 1], [], []>} : vector<64x52xf32>, vector<52x128xf32>, vector<64x128xf32> -> vector<64x128xf32>
    %c0_3 = arith.constant 0 : index
    %c0_4 = arith.constant 0 : index
    %3 = vector.load %arg3[%c0_3, %c0_4] : memref<1x128xf32, #tpu.memory_space<vmem>>, vector<1x128xf32>
    %4 = vector.broadcast %3 : vector<1x128xf32> to vector<64x128xf32>
    %5 = arith.addf %2, %4 : vector<64x128xf32>
    %cst_5 = arith.constant 0.000000e+00 : f32
    %6 = vector.broadcast %cst_5 : f32 to vector<64x128xf32>
    %7 = arith.maximumf %5, %6 : vector<64x128xf32>
    %c0_6 = arith.constant 0 : index
    %c0_7 = arith.constant 0 : index
    %8 = vector.load %arg4[%c0_6, %c0_7] : memref<128x128xf32, #tpu.memory_space<vmem>>, vector<128x128xf32>
    %cst_8 = arith.constant dense<0.000000e+00> : vector<64x128xf32>
    %9 = tpu.matmul %7, %8, %cst_8 {dimension_numbers = #tpu.dot_dimension_numbers<[1], [0], [0], [1], [0, 0, 1, 1], [], []>} : vector<64x128xf32>, vector<128x128xf32>, vector<64x128xf32> -> vector<64x128xf32>
    %c0_9 = arith.constant 0 : index
    %c0_10 = arith.constant 0 : index
    %10 = vector.load %arg5[%c0_9, %c0_10] : memref<1x128xf32, #tpu.memory_space<vmem>>, vector<1x128xf32>
    %11 = vector.broadcast %10 : vector<1x128xf32> to vector<64x128xf32>
    %12 = arith.addf %9, %11 : vector<64x128xf32>
    %c64_i32 = arith.constant 64 : i32
    %13 = arith.muli %arg0, %c64_i32 : i32
    %14 = tpu.iota {dimensions = array<i32: 0>} : vector<64x128xi32>
    %15 = vector.broadcast %13 : i32 to vector<64x128xi32>
    %16 = arith.addi %15, %14 : vector<64x128xi32>
    %c200_i32 = arith.constant 200 : i32
    %17 = vector.broadcast %c200_i32 : i32 to vector<64x128xi32>
    %18 = arith.cmpi slt, %16, %17 : vector<64x128xi32>
    %cst_11 = arith.constant 0.000000e+00 : f32
    %19 = vector.broadcast %cst_11 : f32 to vector<64x128xf32>
    %20 = arith.select %18, %12, %19 : vector<64x128xi1>, vector<64x128xf32>
    %c0_12 = arith.constant 0 : index
    %c0_13 = arith.constant 0 : index
    %21 = vector.load %arg6[%c0_12, %c0_13] : memref<64x128xf32, #tpu.memory_space<vmem>>, vector<64x128xf32>
    tpu.vector_store %arg6[%c0_12, %c0_13], %20 {strides = array<i32>} : memref<64x128xf32, #tpu.memory_space<vmem>>, vector<64x128xf32>,
    return
  }
  func.func @transform_0(%arg0: i32) -> (i32, i32) {
    %c0_i32 = arith.constant 0 : i32
    %c0_i32_0 = arith.constant 0 : i32
    return %arg0, %c0_i32 : i32, i32
  }
  func.func @transform_1(%arg0: i32) -> (i32, i32) {
    %c0_i32 = arith.constant 0 : i32
    %c0_i32_0 = arith.constant 0 : i32
    %c0_i32_1 = arith.constant 0 : i32
    return %c0_i32, %c0_i32_0 : i32, i32
  }
  func.func @transform_2(%arg0: i32) -> (i32, i32) {
    %c0_i32 = arith.constant 0 : i32
    %c0_i32_0 = arith.constant 0 : i32
    %c0_i32_1 = arith.constant 0 : i32
    return %c0_i32, %c0_i32_0 : i32, i32
  }
  func.func @transform_3(%arg0: i32) -> (i32, i32) {
    %c0_i32 = arith.constant 0 : i32
    %c0_i32_0 = arith.constant 0 : i32
    %c0_i32_1 = arith.constant 0 : i32
    return %c0_i32, %c0_i32_0 : i32, i32
  }
  func.func @transform_4(%arg0: i32) -> (i32, i32) {
    %c0_i32 = arith.constant 0 : i32
    %c0_i32_0 = arith.constant 0 : i32
    %c0_i32_1 = arith.constant 0 : i32
    return %c0_i32, %c0_i32_0 : i32, i32
  }
  func.func @transform_5(%arg0: i32) -> (i32, i32) {
    %c0_i32 = arith.constant 0 : i32
    %c0_i32_0 = arith.constant 0 : i32
    return %arg0, %c0_i32 : i32, i32
  }
}

</mosaic_0001>

<bundles_post_ra>
// kernel: tpu_custom_call.1
= control target key start
LH: loop header
LB: loop body
LE: loop exit
PB: predicated region body
PF: predicated region fallthrough
CT: control target
= control target key end

     0   :  { %10 = vsyncpa [#allocation3], 0  ;;  %s902_s0 = inlined_call_operand.vmem [shape: f32[256,52], index: 0, kind: input, shape index: {}]   ;;  %s903_s1 = inlined_call_operand.vmem [shape: f32[52,128], index: 1, kind: input, shape index: {}]   ;;  %s904_s2 = inlined_call_operand.vmem [shape: f32[1,128], index: 2, kind: input, shape index: {}]   ;;  %s905_s3 = inlined_call_operand.vmem [shape: f32[128,128], index: 3, kind: input, shape index: {}]   ;;  %s906_s4 = inlined_call_operand.vmem [shape: f32[1,128], index: 4, kind: input, shape index: {}]   ;;  %s907_s5 = inlined_call_operand.hbm [shape: f32[256,128], index: 5, kind: output, shape index: {}]  }
   0x1   :  { %12 = vsyncpa [#allocation3 + $0x1], 0  ;;  %s706_s18 = smov 0   ;;  %s708_s19 = smov 0  }
   0x2   :  { %s710_s20 = smov 0   ;;  %s712_s21 = smov 0  }
   0x3 LB: > { %s727_s22 = sadd.s32 4294967295, %s672_s21   ;;  %s505_s23 = sadd.s32 4294967294, %s672_s21   ;;  %s672_s21 = sphi %s712_s21, %s913_s21   ;;  %s668_s20 = sphi %s710_s20, %s912_s20   ;;  %s664_s19 = sphi %s708_s19, %s911_s19   ;;  %s660_s18 = sphi %s706_s18, %s910_s18  }
   0x4   : > { %s731_s24 = sadd.s32 1, %s672_s21   ;;  %s135_s25 = sadd.s32 1, %s668_s20 }
   0x5   : > { %s132_s26 = ssub.s32 %s672_s21, %s731_s24  ;;  %p145_p0 = scmp.ne.s32.totalorder %s668_s20, %s664_s19 }
   0x6   : > { %p133_p1 = scmp.eq.s32.totalorder %s132_s26, 0  ;;  %p146_p2 = scmp.eq.s32.totalorder %s727_s22, 3 }
   0x7   : > { %p151_p3 = scmp.ne.s32.totalorder %s664_s19, %s660_s18  ;;  %p152_p4 = scmp.eq.s32.totalorder %s505_s23, 3 }
   0x8   : > { %s742_s27 = scalar_select %p133_p1, %s668_s20, %s135_s25  }
   0x9   : > { %p744_p5 = por %p146_p2, %p145_p0  ;;  %p748_p6 = por %p152_p4, %p151_p3 }
   0xa   : > { %p508_p7 = scmp.ge.s32.totalorder %s672_s21, 1  ;;  %p191_p8 = scmp.lt.s32.totalorder %s672_s21, 5 }
   0xc   : > { %p192_p9 = pnand %p508_p7, %p191_p8 }
   0xd   : > { %s510_s9 = sshll.u32 (!%p192_p9), %s727_s22, 3  ;;  %s521_s11 = sshll.u32 (!%p192_p9), %s727_s22, 6 }
   0xe   : > { %195 = sbr.rel (%p192_p9) target bundleno = 350 (0x15e), region = 40  ;;  %p220_p10 = scmp.lt.s32.totalorder (!%p192_p9), %s510_s9, 31 }
   0xf   : > { %s216_s12 = sand.u32 (!%p192_p9), 1, %s664_s19   ;;  %s439_s25 = scalar_lea.hbm (!%p192_p9), %s907_s5, %s521_s11 }
  0x10   : > { %s509_s15 = sshll.u32 (!%p192_p9), %s216_s12, 6  ;;  %s442_s26 = sshll.u32 (!%p192_p9), %s439_s25, 4  ;;  %s443_s26 = int_to_ptr.hbm [resolvable:$true] %s442_s26 }
  0x11   : > { %s857_s16 = scalar_lea.vmem (!%p192_p9), [#allocation2], %s509_s15  ;;  %s428_s7 = scalar_lea.sflag (!%p192_p9), [#allocation3], %s216_s12 }
  0x12   : > { %s440_s6 = sshll.u32 (!%p192_p9), %s857_s16, 4  ;;  %s624_s22 = sshra.s32 (!%p192_p9), %s443_s26, 4  ;;  %s441_s6 = int_to_ptr.vmem [resolvable:$true] %s440_s6  ;;  %s625_s22 = int_to_ptr.hbm [resolvable:$true] %s624_s22 }
  0x13   : > { %v240_v0 = vld [vmem:[%s903_s1 + $0x30] sm:$0xf]  ;;  %vm270_vm0 = vcmask 1043456   ;;  %v239_v1 = vld [vmem:[%s903_s1 + $0x28] sm:$0xff]  ;;  %v238_v2 = vld [vmem:[%s903_s1 + $0x20] sm:$0xff]  ;;  %s915_s9 = smov (!%p220_p10, %s510_s9), 31  ;;  %v385_v56 = vlaneseq  ;;  %v394_v58 = vstv %s521_s11  ;;  %p631_p0 = scmp.lt.s32.totalorder %s625_s22, %s907_s5 }
  0x14   : > { %512 = vmatpush.msk.msra.mxu0 %vm270_vm0, %v240_v0  ;;  %528 = vmatpush.msk.msra.mxu3 %vm270_vm0, %v240_v0  ;;  %v237_v3 = vld [vmem:[%s903_s1 + $0x18] sm:$0xff]  ;;  %s511_s14 = sshll.u32 %s915_s9, 3  ;;  %v236_v4 = vld [vmem:[%s903_s1 + $0x10] sm:$0xff]  ;;  %v235_v5 = vld [vmem:[%s903_s1 + $0x8] sm:$0xff]  ;;  %vm245_vm1 = vcmask 424960   ;;  %s626_s8 = scalar_lea.hbm %s625_s22, 64 }
  0x15   : > { %s776_s30 = scalar_lea.vmem %s902_s0, %s511_s14  ;;  %v234_v6 = vld [vmem:[%s903_s1] sm:$0xff]  ;;  %v338_v11 = vld [vmem:[%s905_s3 + $0x78] sm:$0xff]  ;;  %v337_v12 = vld [vmem:[%s905_s3 + $0x70] sm:$0xff]  ;;  %v386_v57 = vshrl.u32 %v385_v56, 7  ;;  %p627_p11 = scmp.ne.s32.totalorder %s625_s22, %s626_s8 }
  0x16   : > { %284 = vmatpush.msra.mxu0 %v239_v1  ;;  %529 = vmatpush.msra.mxu3 %v239_v1  ;;  %v226_v7 = vld [vmem:[%s776_s30] sm:$0xff]  ;;  %v232_v8 = vld [vmem:[%s776_s30 + $0x30] sm:$0xff]  ;;  %v227_v9 = vld [vmem:[%s776_s30 + $0x8] sm:$0xff]  ;;  %s630_s10 = scalar_lea.hbm %s907_s5, 256 }
  0x17   : > { %v233_v10 = vld [vmem:[%s776_s30 + $0x38] sm:$0xff]  ;;  %343 = vmatpush.msra.mxu1 %v338_v11  ;;  %v336_v13 = vld [vmem:[%s905_s3 + $0x68] sm:$0xff]  ;;  %535 = vmatpush.msra.mxu2 %v338_v11  ;;  %v335_v14 = vld [vmem:[%s905_s3 + $0x60] sm:$0xff]  ;;  %v395_v59 = vadd.s32 %v394_v58, %v386_v57  ;;  %v387_v62 = vadd.s32 8, %v386_v57  ;;  %p628_p12 = pnand %p627_p11, %p744_p5  ;;  %p632_p1 = scmp.lt.s32.totalorder %s630_s10, %s626_s8 }
  0x18   : > { %285 = vmatpush.msra.mxu0 %v238_v2  ;;  %530 = vmatpush.msra.mxu3 %v238_v2  ;;  %v228_v15 = vld [vmem:[%s776_s30 + $0x10] sm:$0xff]  ;;  %v334_v16 = vld [vmem:[%s905_s3 + $0x58] sm:$0xff]  ;;  %v332_v18 = vld [vmem:[%s905_s3 + $0x48] sm:$0xff] }
  0x19   : > { %344 = vmatpush.msra.mxu1 %v337_v12  ;;  %537 = vmatpush.msra.mxu2 %v337_v12  ;;  %v333_v17 = vld [vmem:[%s905_s3 + $0x50] sm:$0xff]  ;;  %v331_v19 = vld [vmem:[%s905_s3 + $0x40] sm:$0xff]  ;;  %v229_v20 = vld [vmem:[%s776_s30 + $0x18] sm:$0xff]  ;;  %vm403_vm2 = vcmp.lt.s32.totalorder %v395_v59, 200  ;;  %v396_v1 = vadd.s32 %v394_v58, %v387_v62  ;;  %p629_p13 = pneg %p628_p12  ;;  %p633_p2 = por %p632_p1, %p631_p0 }
  0x1a   : > { %286 = vmatpush.msra.mxu0 %v237_v3  ;;  %531 = vmatpush.msra.mxu3 %v237_v3  ;;  %v330_v21 = vld [vmem:[%s905_s3 + $0x38] sm:$0xff]  ;;  %v329_v22 = vld [vmem:[%s905_s3 + $0x30] sm:$0xff]  ;;  %v328_v23 = vld [vmem:[%s905_s3 + $0x28] sm:$0xff]  ;;  %v388_v3 = vadd.s32 16, %v386_v57 }
  0x1b   : > { %345 = vmatpush.msra.mxu1 %v336_v13  ;;  %539 = vmatpush.msra.mxu2 %v336_v13  ;;  %v327_v24 = vld [vmem:[%s905_s3 + $0x20] sm:$0xff]  ;;  %v326_v26 = vld [vmem:[%s905_s3 + $0x18] sm:$0xff]  ;;  %v231_v27 = vld [vmem:[%s776_s30 + $0x28] sm:$0xff]  ;;  %vm404_vm3 = vcmp.lt.s32.totalorder %v396_v1, 200  ;;  %p634_p3 = pnand %p633_p2, %p629_p13 }
  0x1c   : > { %287 = vmatpush.msra.mxu0 %v236_v4  ;;  %532 = vmatpush.msra.mxu3 %v236_v4  ;;  %v230_v25 = vld [vmem:[%s776_s30 + $0x20] sm:$0xff]  ;;  %v325_v28 = vld [vmem:[%s905_s3 + $0x10] sm:$0xff]  ;;  %v324_v29 = vld [vmem:[%s905_s3 + $0x8] sm:$0xff] }
  0x1d   : > { %346 = vmatpush.msra.mxu1 %v335_v14  ;;  %541 = vmatpush.msra.mxu2 %v335_v14  ;;  %v323_v30 = vld [vmem:[%s905_s3] sm:$0xff] }
  0x1e   : > { %288 = vmatpush.msra.mxu0 %v235_v5  ;;  %533 = vmatpush.msra.mxu3 %v235_v5  ;;  %v608_v31 = vld [vmem:[%s904_s2] ss:$0 sm:$0xff] }
  0x1f   : > { %347 = vmatpush.msra.mxu1 %v334_v16  ;;  %543 = vmatpush.msra.mxu2 %v334_v16  ;;  %v609_v60 = vld [vmem:[%s906_s4] ss:$0 sm:$0xff] }
  0x20   : > { %289 = vmatpush.msra.mxu0 %v234_v6  ;;  %534 = vmatpush.msra.mxu3 %v234_v6  ;;  %v397_v6 = vadd.s32 %v394_v58, %v388_v3 }
  0x21   : > { %513 = vmatmul.msk.f32.vlgmr.msra.gmra.mxu0 %vm245_vm1, %v226_v7  ;;  %519 = vmatmul.msk.f32.vlgmr.msra.gmra.mxu3 %vm245_vm1, %v232_v8 }
  0x22   : > { %536 = vmatpush.msrb.mxu3 %v338_v11  ;;  %348 = vmatpush.msra.mxu1 %v333_v17  ;;  %vm405_vm4 = vcmp.lt.s32.totalorder %v397_v6, 200  ;;  %v389_v11 = vadd.s32 24, %v386_v57 }
  0x23   : > { %545 = vmatpush.msra.mxu2 %v333_v17 }
  0x24   : > { %538 = vmatpush.msrb.mxu3 %v337_v12  ;;  %349 = vmatpush.msra.mxu1 %v332_v18 }
  0x25   : > { %547 = vmatpush.msra.mxu2 %v332_v18 }
  0x26   : > { %540 = vmatpush.msrb.mxu3 %v336_v13  ;;  %350 = vmatpush.msra.mxu1 %v331_v19 }
  0x27   : > { %549 = vmatpush.msra.mxu2 %v331_v19 }
  0x28   : > { %542 = vmatpush.msrb.mxu3 %v335_v14  ;;  %351 = vmatpush.msra.mxu1 %v330_v21 }
  0x29   : > { %514 = vmatmul.msk.f32.gmra.mxu0 %vm245_vm1, %v227_v9  ;;  %520 = vmatmul.msk.f32.gmra.mxu3 %vm245_vm1, %v233_v10  ;;  %v393_v10 = vadd.s32 56, %v386_v57 }
  0x2a   : > { %544 = vmatpush.msrb.mxu3 %v334_v16  ;;  %551 = vmatpush.msra.mxu2 %v330_v21  ;;  %v398_v16 = vadd.s32 %v394_v58, %v389_v11 }
  0x2b   : > { %352 = vmatpush.msra.mxu1 %v329_v22  ;;  %v402_v13 = vadd.s32 %v394_v58, %v393_v10 }
  0x2c   : > { %546 = vmatpush.msrb.mxu3 %v333_v17  ;;  %553 = vmatpush.msra.mxu2 %v329_v22  ;;  %vm406_vm6 = vcmp.lt.s32.totalorder %v398_v16, 200 }
  0x2d   : > { %353 = vmatpush.msra.mxu1 %v328_v23  ;;  %vm410_vm5 = vcmp.lt.s32.totalorder %v402_v13, 200 }
  0x2e   : > { %548 = vmatpush.msrb.mxu3 %v332_v18  ;;  %555 = vmatpush.msra.mxu2 %v328_v23  ;;  %v390_v18 = vadd.s32 32, %v386_v57 }
  0x2f   : > { %354 = vmatpush.msra.mxu1 %v327_v24 }
  0x30   : > { %550 = vmatpush.msrb.mxu3 %v331_v19  ;;  %557 = vmatpush.msra.mxu2 %v327_v24 }
  0x31   : > { %515 = vmatmul.msk.f32.gmra.mxu0 %vm245_vm1, %v228_v15  ;;  %355 = vmatpush.msra.mxu1 %v326_v26 }
  0x32   : > { %552 = vmatpush.msrb.mxu3 %v330_v21  ;;  %559 = vmatpush.msra.mxu2 %v326_v26  ;;  %v399_v21 = vadd.s32 %v394_v58, %v390_v18 }
  0x33   : > { %356 = vmatpush.msra.mxu1 %v325_v28 }
  0x34   : > { %554 = vmatpush.msrb.mxu3 %v329_v22  ;;  %561 = vmatpush.msra.mxu2 %v325_v28  ;;  %vm407_vm7 = vcmp.lt.s32.totalorder %v399_v21, 200 }
  0x35   : > { %357 = vmatpush.msra.mxu1 %v324_v29 }
  0x36   : > { %556 = vmatpush.msrb.mxu3 %v328_v23  ;;  %563 = vmatpush.msra.mxu2 %v324_v29  ;;  %v391_v23 = vadd.s32 40, %v386_v57 }
  0x37   : > { %358 = vmatpush.msra.mxu1 %v323_v30 }
  0x38   : > { %558 = vmatpush.msrb.mxu3 %v327_v24  ;;  %565 = vmatpush.msra.mxu2 %v323_v30 }
  0x39   : > { %516 = vmatmul.msk.f32.gmra.mxu0 %vm245_vm1, %v229_v20 }
  0x3a   : > { %560 = vmatpush.msrb.mxu3 %v326_v26  ;;  %v400_v26 = vadd.s32 %v394_v58, %v391_v23 }
  0x3c   : > { %562 = vmatpush.msrb.mxu3 %v325_v28  ;;  %vm408_vm8 = vcmp.lt.s32.totalorder %v400_v26, 200  ;;  %v392_v28 = vadd.s32 48, %v386_v57 }
  0x3e   : > { %564 = vmatpush.msrb.mxu3 %v324_v29 }
  0x40   : > { %566 = vmatpush.msrb.mxu3 %v323_v30 }
  0x41   : > { %517 = vmatmul.msk.f32.gmra.mxu0 %vm245_vm1, %v230_v25 }
  0x49   : > { %518 = vmatmul.msk.f32.gmra.mxu0 %vm245_vm1, %v231_v27 }
  0x9e   : > { %v291_v32 = vpop.f32.mrf.mxu0 }
  0x9f   : > { %v292_v33 = vadd.f32 %v608_v31, %v291_v32 }
  0xa1   : > { %v315_v34 = vmax.f32 %v292_v33, 0.0 }
  0xa3   : > { %359 = vmatmul.f32.vlgmr.msra.gmra.mxu1 %v315_v34 }
  0xa4   : > { %v309_v36 = vpop.f32.mrf.mxu3 }
  0xa5   : > { %v310_v54 = vadd.f32 %v608_v31, %v309_v36 }
  0xa6   : > { %v294_v35 = vpop.f32.mrf.mxu0 }
  0xa7   : > { %v295_v37 = vadd.f32 %v608_v31, %v294_v35  ;;  %v321_v55 = vmax.f32 %v310_v54, 0.0 }
  0xa9   : > { %v316_v38 = vmax.f32 %v295_v37, 0.0 }
  0xab   : > { %362 = vmatmul.f32.gmra.mxu1 %v316_v38 }
  0xac   : > { %v312_v40 = vpop.f32.mrf.mxu3 }
  0xad   : > { %v313_v42 = vadd.f32 %v608_v31, %v312_v40 }
  0xae   : > { %v297_v39 = vpop.f32.mrf.mxu0 }
  0xaf   : > { %v298_v41 = vadd.f32 %v608_v31, %v297_v39  ;;  %v322_v44 = vmax.f32 %v313_v42, 0.0 }
  0xb1   : > { %v317_v43 = vmax.f32 %v298_v41, 0.0  ;;  %380 = vmatmul.f32.vlgmr.msrb.gmra.mxu3 %v322_v44 }
  0xb3   : > { %365 = vmatmul.f32.gmra.mxu1 %v317_v43 }
  0xb6   : > { %v300_v45 = vpop.f32.mrf.mxu0 }
  0xb7   : > { %v301_v46 = vadd.f32 %v608_v31, %v300_v45 }
  0xb9   : > { %v318_v47 = vmax.f32 %v301_v46, 0.0 }
  0xbb   : > { %368 = vmatmul.f32.vlgmr.msra.gmra.mxu2 %v318_v47 }
  0xbe   : > { %v303_v48 = vpop.f32.mrf.mxu0 }
  0xbf   : > { %v304_v49 = vadd.f32 %v608_v31, %v303_v48 }
  0xc1   : > { %v319_v50 = vmax.f32 %v304_v49, 0.0 }
  0xc3   : > { %371 = vmatmul.f32.gmra.mxu2 %v319_v50 }
  0xc6   : > { %v306_v51 = vpop.f32.mrf.mxu0 }
  0xc7   : > { %v307_v52 = vadd.f32 %v608_v31, %v306_v51  ;;  %v401_v31 = vadd.s32 %v394_v58, %v392_v28 }
  0xc9   : > { %v320_v53 = vmax.f32 %v307_v52, 0.0  ;;  %vm409_vm9 = vcmp.lt.s32.totalorder %v401_v31, 200 }
  0xcb   : > { %374 = vmatmul.f32.gmra.mxu2 %v320_v53 }
  0xd3   : > { %377 = vmatmul.f32.gmra.mxu2 %v321_v55 }
 0x120   : > { %v360_v61 = vpop.f32.mrf.mxu1 }
 0x121   : > { %v361_v63 = vadd.f32 %v609_v60, %v360_v61 }
 0x123   : > { %v411_v0 = vsel %vm403_vm2, %v361_v63, 0.0 }
 0x124   : > { %419 = vst [vmem:[%s857_s16] sm:$0xff] %v411_v0 }
 0x128   : > { %v363_v2 = vpop.f32.mrf.mxu1 }
 0x129   : > { %v364_v4 = vadd.f32 %v609_v60, %v363_v2 }
 0x12b   : > { %v412_v5 = vsel %vm404_vm3, %v364_v4, 0.0 }
 0x12c   : > { %420 = vst [vmem:[%s857_s16 + $0x8] sm:$0xff] %v412_v5 }
 0x130   : > { %v366_v7 = vpop.f32.mrf.mxu1 }
 0x131   : > { %v367_v8 = vadd.f32 %v609_v60, %v366_v7 }
 0x133   : > { %v413_v9 = vsel %vm405_vm4, %v367_v8, 0.0 }
 0x134   : > { %421 = vst [vmem:[%s857_s16 + $0x10] sm:$0xff] %v413_v9  ;;  %v381_v12 = vpop.f32.mrf.mxu3 }
 0x135   : > { %v382_v14 = vadd.f32 %v609_v60, %v381_v12 }
 0x137   : > { %v418_v15 = vsel %vm410_vm5, %v382_v14, 0.0 }
 0x138   : > { %426 = vst [vmem:[%s857_s16 + $0x38] sm:$0xff] %v418_v15 }
 0x13e   : > { %v369_v17 = vpop.f32.mrf.mxu2 }
 0x13f   : > { %v370_v19 = vadd.f32 %v609_v60, %v369_v17 }
 0x141   : > { %v414_v20 = vsel %vm406_vm6, %v370_v19, 0.0 }
 0x142   : > { %422 = vst [vmem:[%s857_s16 + $0x18] sm:$0xff] %v414_v20 }
 0x146   : > { %v372_v22 = vpop.f32.mrf.mxu2 }
 0x147   : > { %v373_v24 = vadd.f32 %v609_v60, %v372_v22 }
 0x149   : > { %v415_v25 = vsel %vm407_vm7, %v373_v24, 0.0 }
 0x14a   : > { %423 = vst [vmem:[%s857_s16 + $0x20] sm:$0xff] %v415_v25 }
 0x14e   : > { %v375_v27 = vpop.f32.mrf.mxu2 }
 0x14f   : > { %v376_v29 = vadd.f32 %v609_v60, %v375_v27 }
 0x151   : > { %v416_v30 = vsel %vm408_vm8, %v376_v29, 0.0 }
 0x152   : > { %424 = vst [vmem:[%s857_s16 + $0x28] sm:$0xff] %v416_v30 }
 0x156   : > { %v378_v32 = vpop.f32.mrf.mxu2 }
 0x157   : > { %v379_v33 = vadd.f32 %v609_v60, %v378_v32 }
 0x159   : > { %v417_v34 = vsel %vm409_vm9, %v379_v33, 0.0 }
 0x15a   : > { %425 = vst [vmem:[%s857_s16 + $0x30] sm:$0xff] %v417_v34 }
 0x15b   : > { %637 = shalt.err (!%p634_p3)
}
 0x15c   : > { %s674_s12 = smov 128   ;;  %s675_s14 = smov 8  }
 0x15d   : > { %567 = dma.vmem_to_hbm [thread:$0]  (%p744_p5), %s441_s6, 1024, %s443_s26, %s428_s7, %s674_s12, %s674_s12, %s675_s14  }
 0x15e PF: > { %p573_p4 = scmp.ge.s32.totalorder %s672_s21, 2  ;;  %s457_s15 = sand.u32 1, %s660_s18  }
 0x15f   : > { %s458_s16 = scalar_lea.sflag [#allocation3], %s457_s15 }
 0x160   : > { %p570_p7 = pnand %p573_p4, %p748_p6 }
 0x162   : > { %p571_p8 = pneg %p570_p7 }
 0x164   : > { %655 = dma.done.wait (%p571_p8), %s458_s16, 1024  }
 0x165   : > { %657 = vsyncadd (%p571_p8), %s458_s16, 4294966272  ;;  %p15_p9 = scmp.ge.s32.totalorder %s731_s24, 6   ;;  %s910_s18 = smov %s664_s19 }
 0x166   : > { %s911_s19 = smov %s668_s20  ;;  %s912_s20 = smov %s742_s27 }
 0x167   : > { %s913_s21 = smov %s731_s24  ;;  %17 = sbr.rel (!%p15_p9) target bundleno = 3 (0x3), region = 75 }
 0x16c   :  { %464 = vsyncpa [#allocation3], 1 }
 0x16d   :  { %466 = vsyncpa [#allocation3 + $0x1], 1 }

</bundles_post_ra>
